<compile_context>
chip_gen: v7x
topology: tpu7x:2x2x1
jax: 0.10.0
libtpu: 0.0.40
codegen_flags: <defaults>
</compile_context>

<pallas_src>
import functools

import jax
import jax.numpy as jnp
from jax import lax
from jax.experimental import pallas as pl
from jax.experimental.pallas import tpu as pltpu


def _round_up(x, m):
    return ((x + m - 1) // m) * m


def _triplet_softmax_kernel(anchor_ref, pos_ref, neg_ref, logits_ref, labels_ref,
                            trip_ref, ce_ref, *, margin, batch_size, block_rows):
    # Upcast inside the kernel (inputs may be bf16); all math in f32.
    a = anchor_ref[...].astype(jnp.float32)            # (TB, D)
    p = pos_ref[...].astype(jnp.float32)                # (TB, D)
    n = neg_ref[...].astype(jnp.float32)                # (TB, D)

    # Fused |a-p| - |a-n| L1 row reduction: one cross-lane reduce, 2-D result.
    diff = jnp.sum(jnp.abs(a - p) - jnp.abs(a - n), axis=1, keepdims=True)   # (TB, 1)
    losses = jnp.maximum(diff + margin, 0.0)                                  # (TB, 1)

    # Mask rows belonging to the zero-padded tail of the last block.
    row0 = pl.program_id(0) * block_rows
    rows = row0 + lax.broadcasted_iota(jnp.int32, losses.shape, 0)            # (TB, 1)
    valid = rows < batch_size

    trip_ref[0, 0] = jnp.sum(jnp.where(valid, losses, 0.0))

    # Cross-entropy terms: logsumexp(logits) - logits[label], summed per block.
    logits = logits_ref[...].astype(jnp.float32)                              # (TB, C)
    labels = labels_ref[...]                                                  # (TB, 1) i32
    row_max = jnp.max(logits, axis=1, keepdims=True)                          # (TB, 1)
    lse = jnp.log(jnp.sum(jnp.exp(logits - row_max), axis=1, keepdims=True)) + row_max
    col_ids = lax.broadcasted_iota(jnp.int32, logits.shape, 1)                # (TB, C)
    picked = jnp.sum(jnp.where(col_ids == labels, logits, 0.0),
                     axis=1, keepdims=True)                                   # (TB, 1)
    ce_terms = lse - picked                                                   # (TB, 1)

    ce_ref[0, 0] = jnp.sum(jnp.where(valid, ce_terms, 0.0))


def _choose_block_rows(batch, dim, n_classes, itemsize):
    # Per-row bytes across the 5 inputs, x2 for double buffering; keep the
    # input blocks under ~8 MiB so buffers + f32 intermediates stay well
    # inside the smallest scoped-VMEM budgets (v5e 16 MiB, v7x 32 of 64 MiB).
    per_row = 2 * (3 * dim + n_classes + 1) * max(int(itemsize), 4)
    budget = 8 * 1024 * 1024
    tb = max(8, min(1024, budget // max(per_row, 1)))
    tb = (tb // 8) * 8
    tb = min(tb, _round_up(batch, 8))
    return max(tb, 8)


def triplet_softmax_loss(anchor, positive, negative, outputs, labels,
                         *, margin=0.0, lambda_factor=0.0, block_rows=None):
    """Returns (loss_total, triplet_losses_sum, loss_softmax) as f32 scalars."""
    B, D = anchor.shape
    C = outputs.shape[-1]
    labels2d = labels.reshape(B, 1).astype(jnp.int32)

    itemsize = jnp.dtype(anchor.dtype).itemsize
    if block_rows is None:
        tb = _choose_block_rows(B, D, C, itemsize)
    else:
        tb = max(8, _round_up(int(block_rows), 8))
    num_blocks = -(-B // tb)
    b_pad = num_blocks * tb

    def pad_rows(x):
        if b_pad == B:
            return x
        return jnp.pad(x, ((0, b_pad - B), (0, 0)))

    args = tuple(pad_rows(x) for x in
                 (anchor, positive, negative, outputs, labels2d))

    kernel = functools.partial(_triplet_softmax_kernel,
                               margin=float(margin),
                               batch_size=B,
                               block_rows=tb)

    def row_spec(cols):
        return pl.BlockSpec((tb, cols), lambda i: (i, 0))

    smem_out = pl.BlockSpec((1, 1), lambda i: (i, 0), memory_space=pltpu.SMEM)
    part_shape = jax.ShapeDtypeStruct((num_blocks, 1), jnp.float32)

    trip_parts, ce_parts = pl.pallas_call(
        kernel,
        out_shape=(part_shape, part_shape),
        grid=(num_blocks,),
        in_specs=[row_spec(D), row_spec(D), row_spec(D), row_spec(C), row_spec(1)],
        out_specs=(smem_out, smem_out),
        compiler_params=pltpu.CompilerParams(
            dimension_semantics=("parallel",),
            vmem_limit_bytes=32 * 1024 * 1024),
    )(*args)

    # Tiny final reduction over per-block partials in plain JAX.
    trip_sum = jnp.sum(trip_parts)
    loss_softmax = jnp.sum(ce_parts) / B          # global mean, not per-tile mean
    loss_total = lambda_factor * trip_sum + loss_softmax
    return loss_total, trip_sum, loss_softmax


def _reference(anchor, positive, negative, outputs, labels, margin, lambda_factor):
    dp = jnp.sum(jnp.abs(anchor - positive), axis=1)
    dn = jnp.sum(jnp.abs(anchor - negative), axis=1)
    losses = jnp.maximum(dp - dn + margin, 0.0)
    logz = jax.nn.logsumexp(outputs, axis=1)
    picked = jnp.take_along_axis(outputs, labels[:, None], axis=1)[:, 0]
    ce = jnp.mean(logz - picked)
    return lambda_factor * jnp.sum(losses) + ce, jnp.sum(losses), ce


def _run_case(key, B, D, C, margin, lam, dtype, block_rows=None,
              rtol=1e-5, atol=1e-5):
    k_a, k_p, k_n, k_o, k_l = jax.random.split(key, 5)
    anchor = jax.random.normal(k_a, (B, D), dtype=jnp.float32).astype(dtype)
    positive = jax.random.normal(k_p, (B, D), dtype=jnp.float32).astype(dtype)
    negative = jax.random.normal(k_n, (B, D), dtype=jnp.float32).astype(dtype)
    outputs = jax.random.normal(k_o, (B, C), dtype=jnp.float32).astype(dtype)
    labels = jax.random.randint(k_l, (B,), 0, C, dtype=jnp.int32)

    total, trip, ce = triplet_softmax_loss(
        anchor, positive, negative, outputs, labels,
        margin=margin, lambda_factor=lam, block_rows=block_rows)
    jax.block_until_ready((total, trip, ce))

    ref_total, ref_trip, ref_ce = _reference(
        anchor.astype(jnp.float32), positive.astype(jnp.float32),
        negative.astype(jnp.float32), outputs.astype(jnp.float32),
        labels, margin, lam)
    assert jnp.allclose(total, ref_total, rtol=rtol, atol=atol), (total, ref_total)
    assert jnp.allclose(trip, ref_trip, rtol=rtol, atol=atol), (trip, ref_trip)
    assert jnp.allclose(ce, ref_ce, rtol=rtol, atol=atol), (ce, ref_ce)


if __name__ == "__main__":
    key = jax.random.PRNGKey(0)
    k1, k2, k3 = jax.random.split(key, 3)

    # Small case (exercises the masked padded-tail path: B=12 -> one 16-row block).
    _run_case(k1, B=12, D=32, C=16, margin=1.0, lam=0.1, dtype=jnp.float32)

    # Multi-block grid (3 blocks of 128 rows, 84 padded rows masked in the last).
    _run_case(k2, B=300, D=64, C=32, margin=0.5, lam=0.2, dtype=jnp.float32,
              block_rows=128)

    # Native bf16 inputs, upcast inside the kernel (looser tolerance).
    _run_case(k3, B=64, D=128, C=16, margin=1.0, lam=0.1, dtype=jnp.bfloat16,
              rtol=1e-4, atol=1e-4)

    print("KERNEL_OK")
</pallas_src>

<mosaic_0001>
module attributes {stable_mosaic.version = 11 : i64} {
  func.func @_triplet_softmax_kernel(%arg0: i32, %arg1: memref<16x32xf32, #tpu.memory_space<vmem>>, %arg2: memref<16x32xf32, #tpu.memory_space<vmem>>, %arg3: memref<16x32xf32, #tpu.memory_space<vmem>>, %arg4: memref<16x16xf32, #tpu.memory_space<vmem>>, %arg5: memref<16x1xi32, #tpu.memory_space<vmem>>, %arg6: memref<1x1xf32, #tpu.memory_space<smem>>, %arg7: memref<1x1xf32, #tpu.memory_space<smem>>) attributes {dimension_semantics = [#tpu.dimension_semantics<parallel>], iteration_bounds = array<i64: 1>, scalar_prefetch = 0 : i64, scratch_operands = 0 : i64, tpu.core_type = #tpu.core_type<tc>, window_params = [{transform_indices = @transform_0, window_bounds = array<i64: 16, 32>}, {transform_indices = @transform_1, window_bounds = array<i64: 16, 32>}, {transform_indices = @transform_2, window_bounds = array<i64: 16, 32>}, {transform_indices = @transform_3, window_bounds = array<i64: 16, 16>}, {transform_indices = @transform_4, window_bounds = array<i64: 16, 1>}, {transform_indices = @transform_5, window_bounds = array<i64: 1, 1>}, {transform_indices = @transform_6, window_bounds = array<i64: 1, 1>}]} {
    %c0 = arith.constant 0 : index
    %c0_0 = arith.constant 0 : index
    %0 = vector.load %arg1[%c0, %c0_0] : memref<16x32xf32, #tpu.memory_space<vmem>>, vector<16x32xf32>
    %c0_1 = arith.constant 0 : index
    %c0_2 = arith.constant 0 : index
    %1 = vector.load %arg2[%c0_1, %c0_2] : memref<16x32xf32, #tpu.memory_space<vmem>>, vector<16x32xf32>
    %c0_3 = arith.constant 0 : index
    %c0_4 = arith.constant 0 : index
    %2 = vector.load %arg3[%c0_3, %c0_4] : memref<16x32xf32, #tpu.memory_space<vmem>>, vector<16x32xf32>
    %3 = arith.subf %0, %1 : vector<16x32xf32>
    %4 = math.absf %3 : vector<16x32xf32>
    %5 = arith.subf %0, %2 : vector<16x32xf32>
    %6 = math.absf %5 : vector<16x32xf32>
    %7 = arith.subf %4, %6 : vector<16x32xf32>
    %cst = arith.constant dense<0.000000e+00> : vector<16xf32>
    %8 = vector.multi_reduction <add>, %7, %cst [1] : vector<16x32xf32> to vector<16xf32>
    %9 = vector.shape_cast %8 : vector<16xf32> to vector<16x1xf32>
    %cst_5 = arith.constant 1.000000e+00 : f32
    %10 = vector.broadcast %cst_5 : f32 to vector<16x1xf32>
    %11 = arith.addf %9, %10 : vector<16x1xf32>
    %cst_6 = arith.constant 0.000000e+00 : f32
    %12 = vector.broadcast %cst_6 : f32 to vector<16x1xf32>
    %13 = arith.maximumf %11, %12 : vector<16x1xf32>
    %c16_i32 = arith.constant 16 : i32
    %14 = arith.muli %arg0, %c16_i32 : i32
    %15 = tpu.iota {dimensions = array<i32: 0>} : vector<16x1xi32>
    %16 = vector.broadcast %14 : i32 to vector<16x1xi32>
    %17 = arith.addi %16, %15 : vector<16x1xi32>
    %c12_i32 = arith.constant 12 : i32
    %18 = vector.broadcast %c12_i32 : i32 to vector<16x1xi32>
    %19 = arith.cmpi slt, %17, %18 : vector<16x1xi32>
    %cst_7 = arith.constant 0.000000e+00 : f32
    %20 = vector.broadcast %cst_7 : f32 to vector<16x1xf32>
    %21 = arith.select %19, %13, %20 : vector<16x1xi1>, vector<16x1xf32>
    %22 = vector.shape_cast %21 : vector<16x1xf32> to vector<1x16x1xf32>
    %cst_8 = arith.constant dense<0.000000e+00> : vector<1xf32>
    %23 = vector.multi_reduction <add>, %22, %cst_8 [1, 2] : vector<1x16x1xf32> to vector<1xf32>
    %24 = vector.shape_cast %23 : vector<1xf32> to vector<1x1x1xf32>
    %25 = vector.extract %24[0, 0, 0] : f32 from vector<1x1x1xf32>
    %c0_9 = arith.constant 0 : index
    %c0_10 = arith.constant 0 : index
    %26 = memref.load %arg6[%c0_9, %c0_10] : memref<1x1xf32, #tpu.memory_space<smem>>
    memref.store %25, %arg6[%c0_9, %c0_10] : memref<1x1xf32, #tpu.memory_space<smem>>
    %c0_11 = arith.constant 0 : index
    %c0_12 = arith.constant 0 : index
    %27 = vector.load %arg4[%c0_11, %c0_12] : memref<16x16xf32, #tpu.memory_space<vmem>>, vector<16x16xf32>
    %c0_13 = arith.constant 0 : index
    %c0_14 = arith.constant 0 : index
    %28 = vector.load %arg5[%c0_13, %c0_14] : memref<16x1xi32, #tpu.memory_space<vmem>>, vector<16x1xi32>
    %cst_15 = arith.constant dense<0xFF800000> : vector<16xf32>
    %29 = vector.multi_reduction <maximumf>, %27, %cst_15 [1] : vector<16x16xf32> to vector<16xf32>
    %30 = vector.shape_cast %29 : vector<16xf32> to vector<16x1xf32>
    %31 = vector.broadcast %30 : vector<16x1xf32> to vector<16x16xf32>
    %32 = arith.subf %27, %31 : vector<16x16xf32>
    %33 = math.exp %32 : vector<16x16xf32>
    %cst_16 = arith.constant dense<0.000000e+00> : vector<16xf32>
    %34 = vector.multi_reduction <add>, %33, %cst_16 [1] : vector<16x16xf32> to vector<16xf32>
    %35 = vector.shape_cast %34 : vector<16xf32> to vector<16x1xf32>
    %36 = math.log %35 : vector<16x1xf32>
    %37 = arith.addf %36, %30 : vector<16x1xf32>
    %38 = tpu.iota {dimensions = array<i32: 1>} : vector<16x16xi32>
    %39 = vector.broadcast %28 : vector<16x1xi32> to vector<16x16xi32>
    %40 = arith.cmpi eq, %38, %39 : vector<16x16xi32>
    %cst_17 = arith.constant 0.000000e+00 : f32
    %41 = vector.broadcast %cst_17 : f32 to vector<16x16xf32>
    %42 = arith.select %40, %27, %41 : vector<16x16xi1>, vector<16x16xf32>
    %cst_18 = arith.constant dense<0.000000e+00> : vector<16xf32>
    %43 = vector.multi_reduction <add>, %42, %cst_18 [1] : vector<16x16xf32> to vector<16xf32>
    %44 = vector.shape_cast %43 : vector<16xf32> to vector<16x1xf32>
    %45 = arith.subf %37, %44 : vector<16x1xf32>
    %cst_19 = arith.constant 0.000000e+00 : f32
    %46 = vector.broadcast %cst_19 : f32 to vector<16x1xf32>
    %47 = arith.select %19, %45, %46 : vector<16x1xi1>, vector<16x1xf32>
    %48 = vector.shape_cast %47 : vector<16x1xf32> to vector<1x16x1xf32>
    %cst_20 = arith.constant dense<0.000000e+00> : vector<1xf32>
    %49 = vector.multi_reduction <add>, %48, %cst_20 [1, 2] : vector<1x16x1xf32> to vector<1xf32>
    %50 = vector.shape_cast %49 : vector<1xf32> to vector<1x1x1xf32>
    %51 = vector.extract %50[0, 0, 0] : f32 from vector<1x1x1xf32>
    %c0_21 = arith.constant 0 : index
    %c0_22 = arith.constant 0 : index
    %52 = memref.load %arg7[%c0_21, %c0_22] : memref<1x1xf32, #tpu.memory_space<smem>>
    memref.store %51, %arg7[%c0_21, %c0_22] : memref<1x1xf32, #tpu.memory_space<smem>>
    return
  }
  func.func @transform_0(%arg0: i32) -> (i32, i32) {
    %c0_i32 = arith.constant 0 : i32
    %c0_i32_0 = arith.constant 0 : i32
    return %arg0, %c0_i32 : i32, i32
  }
  func.func @transform_1(%arg0: i32) -> (i32, i32) {
    %c0_i32 = arith.constant 0 : i32
    %c0_i32_0 = arith.constant 0 : i32
    return %arg0, %c0_i32 : i32, i32
  }
  func.func @transform_2(%arg0: i32) -> (i32, i32) {
    %c0_i32 = arith.constant 0 : i32
    %c0_i32_0 = arith.constant 0 : i32
    return %arg0, %c0_i32 : i32, i32
  }
  func.func @transform_3(%arg0: i32) -> (i32, i32) {
    %c0_i32 = arith.constant 0 : i32
    %c0_i32_0 = arith.constant 0 : i32
    return %arg0, %c0_i32 : i32, i32
  }
  func.func @transform_4(%arg0: i32) -> (i32, i32) {
    %c0_i32 = arith.constant 0 : i32
    %c0_i32_0 = arith.constant 0 : i32
    return %arg0, %c0_i32 : i32, i32
  }
  func.func @transform_5(%arg0: i32) -> (i32, i32) {
    %c0_i32 = arith.constant 0 : i32
    %c0_i32_0 = arith.constant 0 : i32
    return %arg0, %c0_i32 : i32, i32
  }
  func.func @transform_6(%arg0: i32) -> (i32, i32) {
    %c0_i32 = arith.constant 0 : i32
    %c0_i32_0 = arith.constant 0 : i32
    return %arg0, %c0_i32 : i32, i32
  }
}

</mosaic_0001>

<bundles_post_ra>
// kernel: tpu_custom_call.1
= control target key start
LH: loop header
LB: loop body
LE: loop exit
PB: predicated region body
PF: predicated region fallthrough
CT: control target
= control target key end

     0   :  { %12 = vsyncpa [#allocation3], 0  ;;  %s477_s0 = inlined_call_operand.vmem [shape: f32[16,32], index: 0, kind: input, shape index: {}]   ;;  %s478_s1 = inlined_call_operand.hbm [shape: f32[16,32], index: 1, kind: input, shape index: {}]   ;;  %s479_s2 = inlined_call_operand.hbm [shape: f32[16,32], index: 2, kind: input, shape index: {}]   ;;  %s480_s3 = inlined_call_operand.hbm [shape: f32[16,16], index: 3, kind: input, shape index: {}]   ;;  %s481_s4 = inlined_call_operand.vmem [shape: s32[16,1], index: 4, kind: input, shape index: {}]   ;;  %s482_s5 = inlined_call_operand.hbm [shape: f32[1,1], index: 5, kind: output, shape index: {0}]   ;;  %s483_s6 = inlined_call_operand.hbm [shape: f32[1,1], index: 6, kind: output, shape index: {1}]  }
   0x1   :  { %13 = vsyncpa [#allocation6], 0 }
   0x2   :  { %14 = vsyncpa [#allocation4], 0 }
   0x3   :  { %15 = vsyncpa [#allocation10], 0  ;;  %s326_s21 = smov [#allocation5]   ;;  %s327_s23 = smov [#allocation2]  }
   0x4   :  { %s35_s22 = sshll.u32 %s326_s21, 4  ;;  %s23_s24 = sshll.u32 %s327_s23, 4  ;;  %s36_s22 = int_to_ptr.vmem [resolvable:$true] %s35_s22  ;;  %s369_s24 = int_to_ptr.vmem [resolvable:$true] %s23_s24 }
   0x5   :  { %s232_s27 = scalar_lea.hbm %s479_s2, 256 }
   0x6   :  { %p233_p0 = scmp.ne.s32.totalorder %s479_s2, %s232_s27  ;;  %p236_p1 = scmp.lt.u32.totalorder %s232_s27, %s479_s2 }
   0x8   :  { %p238_p2 = pnand %p236_p1, %p233_p0 }
   0xa   :  { %241 = shalt.err (!%p238_p2)
}
   0xb   :  { %s242_s8 = scalar_lea.vmem %s36_s22, 256  ;;  %p247_p4 = scmp.lt.s32.totalorder %s36_s22, %s36_s22 }
   0xc   :  { %p243_p3 = scmp.ne.s32.totalorder %s36_s22, %s242_s8  ;;  %p248_p5 = scmp.lt.s32.totalorder %s242_s8, %s242_s8 }
   0xe   :  { %p249_p6 = por %p248_p5, %p247_p4 }
  0x10   :  { %p250_p7 = pnand %p249_p6, %p243_p3 }
  0x12   :  { %253 = shalt.err (!%p250_p7)
}
  0x13   :  { %s328_s9 = smov 128   ;;  %s329_s10 = smov 8  }
  0x14   :  { %41 = dma.hbm_to_vmem [thread:$0]  %s479_s2, 256, %s36_s22, [#allocation6], %s328_s9, %s328_s9, %s329_s10  }
  0x15   :  { %s254_s15 = scalar_lea.hbm %s478_s1, 256 }
  0x16   :  { %p255_p8 = scmp.ne.s32.totalorder %s478_s1, %s254_s15  ;;  %p258_p9 = scmp.lt.u32.totalorder %s254_s15, %s478_s1 }
  0x18   :  { %p260_p10 = pnand %p258_p9, %p255_p8 }
  0x1a   :  { %263 = shalt.err (!%p260_p10)
}
  0x1b   :  { %s264_s20 = scalar_lea.vmem %s369_s24, 256  ;;  %p269_p12 = scmp.lt.s32.totalorder %s369_s24, %s369_s24 }
  0x1c   :  { %p265_p11 = scmp.ne.s32.totalorder %s369_s24, %s264_s20  ;;  %p270_p13 = scmp.lt.s32.totalorder %s264_s20, %s264_s20 }
  0x1e   :  { %p271_p0 = por %p270_p13, %p269_p12 }
  0x20   :  { %p272_p1 = pnand %p271_p0, %p265_p11 }
  0x22   :  { %275 = shalt.err (!%p272_p1)
}
  0x23   :  { %29 = dma.hbm_to_vmem [thread:$0]  %s478_s1, 256, %s369_s24, [#allocation3], %s328_s9, %s328_s9, %s329_s10  }
  0x24   :  { %s330_s22 = smov [#allocation7]   ;;  %s276_s27 = scalar_lea.hbm %s480_s3, 256 }
  0x25   :  { %s47_s23 = sshll.u32 %s330_s22, 4  ;;  %p277_p2 = scmp.ne.s32.totalorder %s480_s3, %s276_s27  ;;  %s48_s23 = int_to_ptr.vmem [resolvable:$true] %s47_s23 }
  0x26   :  { %p280_p3 = scmp.lt.u32.totalorder %s276_s27, %s480_s3 }
  0x28   :  { %p282_p4 = pnand %p280_p3, %p277_p2 }
  0x2a   :  { %285 = shalt.err (!%p282_p4)
}
  0x2b   :  { %s286_s8 = scalar_lea.vmem %s48_s23, 256  ;;  %p291_p6 = scmp.lt.s32.totalorder %s48_s23, %s48_s23 }
  0x2c   :  { %p287_p5 = scmp.ne.s32.totalorder %s48_s23, %s286_s8  ;;  %p292_p7 = scmp.lt.s32.totalorder %s286_s8, %s286_s8 }
  0x2e   :  { %p293_p8 = por %p292_p7, %p291_p6 }
  0x30   :  { %p294_p9 = pnand %p293_p8, %p287_p5 }
  0x32   :  { %297 = shalt.err (!%p294_p9)
}
  0x33   :  { %53 = dma.hbm_to_vmem [thread:$0]  %s480_s3, 256, %s48_s23, [#allocation6], %s328_s9, %s328_s9, %s329_s10  }
  0x34   :  { %318 = dma.done.wait [#allocation3], 256  }
  0x35   :  { %319 = vsyncadd [#allocation3], 4294967040 }
  0x36   :  { %320 = dma.done.wait [#allocation6], 512  }
  0x37   :  { %321 = vsyncadd [#allocation6], 4294966784  ;;  %v331_v0 = vmov 0   ;;  %vm122_vm0 = vcmask 130048   ;;  %v119_v1 = vld [vmem:[#allocation7 + $0x8] sm:$0xff]  ;;  %v118_v2 = vld [vmem:[#allocation7] sm:$0xff]  ;;  %v93_v25 = vlaneseq }
  0x38   :  { %222 = vset.pattern.permute.xlu1 %v331_v0  ;;  %223 = vset.pattern.permute.xlu0 %v331_v0  ;;  %v121_v3 = vld [vmem:[%s481_s4 + $0x8] sm:$0xff]  ;;  %v126_v4 = vsel %vm122_vm0, %v119_v1, -inf  ;;  %v120_v5 = vld [vmem:[%s481_s4] sm:$0xff]  ;;  %v123_v6 = vsel %vm122_vm0, %v118_v2, -inf  ;;  %v70_v12 = vld [vmem:[#allocation5 + $0x8] sm:$0xff]  ;;  %vm81_vm1 = vcmask 261120  }
  0x39   :  { %153 = vperm.xlu1 %222, %v121_v3   ;;  %127 = vmax.xlane.f32.xlu0 %v126_v4  ;;  %v66_v10 = vld [vmem:[%s477_s0 + $0x8] sm:$0xff]  ;;  %v65_v18 = vld [vmem:[%s477_s0] sm:$0xff]  ;;  %v69_v20 = vld [vmem:[#allocation5] sm:$0xff]  ;;  %v148_v32 = vand.u32 127, %v93_v25  ;;  %v94_v43 = vshrl.u32 %v93_v25, 7  ;;  %vm103_vm5 = vcmask 7168  }
  0x3a   :  { %v68_v11 = vld [vmem:[#allocation2 + $0x8] sm:$0xff]  ;;  %v76_v16 = vsub.f32 %v66_v10, %v70_v12  ;;  %v67_v19 = vld [vmem:[#allocation2] sm:$0xff]  ;;  %v75_v24 = vsub.f32 %v65_v18, %v69_v20  ;;  %s298_s17 = scalar_lea.hbm %s482_s5, 16 }
  0x3b   :  { %v72_v15 = vsub.f32 %v66_v10, %v68_v11  ;;  %v71_v23 = vsub.f32 %v65_v18, %v67_v19  ;;  %v95_v45 = vadd.s32 8, %v94_v43  ;;  %p299_p10 = scmp.ne.s32.totalorder %s482_s5, %s298_s17  ;;  %p302_p11 = scmp.lt.u32.totalorder %s298_s17, %s482_s5 }
  0x3c   :  { %v78_v22 = vand.u32 2147483647, %v76_v16  ;;  %v77_v28 = vand.u32 2147483647, %v75_v24 }
  0x3d   :  { %150 = vperm.xlu1 %222, %v120_v5   ;;  %124 = vmax.xlane.f32.xlu0 %v123_v6  ;;  %v74_v21 = vand.u32 2147483647, %v72_v15  ;;  %v73_v27 = vand.u32 2147483647, %v71_v23  ;;  %vm100_vm4 = vcmp.lt.s32.totalorder %v95_v45, 12  ;;  %p304_p12 = pnand %p302_p11, %p299_p10 }
  0x3f   :  { %v80_v26 = vsub.f32 %v74_v21, %v78_v22  ;;  %v79_v34 = vsub.f32 %v73_v27, %v77_v28 }
  0x41   :  { %v85_v33 = vsel %vm81_vm1, %v80_v26, 0.0  ;;  %v82_v38 = vsel %vm81_vm1, %v79_v34, 0.0 }
  0xb8   :  { %v154_v30 = vpop.permute.xlu1 %153 }
  0xb9   :  { %vm156_vm2 = vcmp.eq.s32.totalorder %v148_v32, %v154_v30 }
  0xba   :  { %v158_v39 = vsel %vm156_vm2, %v119_v1, 0.0 }
  0xbb   :  { %v162_v40 = vsel %vm122_vm0, %v158_v39, 0.0 }
  0xbc   :  { %v151_v37 = vpop.permute.xlu1 %150 }
  0xbd   :  { %vm155_vm3 = vcmp.eq.s32.totalorder %v148_v32, %v151_v37 }
  0xbe   :  { %v157_v41 = vsel %vm155_vm3, %v118_v2, 0.0 }
  0xbf   :  { %v159_v42 = vsel %vm122_vm0, %v157_v41, 0.0 }
  0xc6   :  { %v429_v7 = vpop.xlane.xlu0 %127 }
  0xc7   :  { %v130_v8 = vsub.f32 %v119_v1, %v429_v7 }
  0xc9   :  { %v133_v9 = vmul.f32 1.442695, %v130_v8 }
  0xca   :  { %v435_v13 = vpop.xlane.xlu0 %124 }
  0xcb   :  { %224 = vpow2.f32 %v133_v9  ;;  %v129_v14 = vsub.f32 %v118_v2, %v435_v13 }
  0xcd   :  { %v131_v17 = vmul.f32 1.442695, %v129_v14 }
  0xcf   :  { %226 = vpow2.f32 %v131_v17 }
  0xd5   :  { %v225_v29 = vpop.eup %224 }
  0xd6   :  { %v138_v31 = vsel %vm122_vm0, %v225_v29, 0.0 }
  0xd7   :  { %139 = vadd.xlane.f32.xlu0 %v138_v31 }
  0xd9   :  { %v227_v35 = vpop.eup %226 }
  0xda   :  { %v135_v36 = vsel %vm122_vm0, %v227_v35, 0.0 }
  0xdb   :  { %136 = vadd.xlane.f32.xlu1 %v135_v36  ;;  %86 = vadd.xlane.f32.xlu0 %v85_v33 }
  0xdf   :  { %83 = vadd.xlane.f32.xlu0 %v82_v38 }
  0xe3   :  { %163 = vadd.xlane.f32.xlu0 %v162_v40 }
  0xe7   :  { %160 = vadd.xlane.f32.xlu0 %v159_v42 }
 0x164   :  { %v140_v44 = vpop.xlane.xlu0 %139 }
 0x165   :  { %228 = vlog2.f32 %v140_v44 }
 0x168   :  { %v137_v46 = vpop.xlane.xlu1 %136  ;;  %v87_v47 = vpop.xlane.xlu0 %86 }
 0x169   :  { %230 = vlog2.f32 %v137_v46  ;;  %v89_v48 = vadd.f32 1.0, %v87_v47 }
 0x16b   :  { %v91_v49 = vmax.f32 %v89_v48, 0.0 }
 0x16c   :  { %v84_v50 = vpop.xlane.xlu0 %83 }
 0x16d   :  { %v102_v51 = vsel %vm100_vm4, %v91_v49, 0.0  ;;  %v88_v52 = vadd.f32 1.0, %v84_v50 }
 0x16e   :  { %v105_v55 = vsel %vm103_vm5, %v102_v51, 0.0 }
 0x16f   :  { %v229_v53 = vpop.eup %228  ;;  %v90_v54 = vmax.f32 %v88_v52, 0.0 }
 0x170   :  { %v144_v56 = vmul.f32 0.6931472, %v229_v53  ;;  %v164_v57 = vpop.xlane.xlu0 %163 }
 0x171   :  { %v104_v58 = vsel %vm103_vm5, %v90_v54, 0.0 }
 0x172   :  { %v146_v59 = vadd.f32 %v144_v56, %v429_v7  ;;  %v106_v60 = vadd.f32 %v105_v55, %v104_v58 }
 0x173   :  { %v231_v61 = vpop.eup %230 }
 0x174   :  { %v142_v62 = vmul.f32 0.6931472, %v231_v61  ;;  %v166_v63 = vsub.f32 %v146_v59, %v164_v57  ;;  %107 = vadd.xlane.f32.xlu0 %v106_v60  ;;  %v161_v2 = vpop.xlane.xlu0 %160 }
 0x176   :  { %v145_v0 = vadd.f32 %v142_v62, %v435_v13  ;;  %v168_v1 = vsel %vm100_vm4, %v166_v63, 0.0 }
 0x177   :  { %v170_v5 = vsel %vm103_vm5, %v168_v1, 0.0 }
 0x178   :  { %v165_v3 = vsub.f32 %v145_v0, %v161_v2 }
 0x17a   :  { %v169_v4 = vsel %vm103_vm5, %v165_v3, 0.0 }
 0x17b   :  { %v171_v6 = vadd.f32 %v170_v5, %v169_v4 }
 0x17d   :  { %172 = vadd.xlane.f32.xlu0 %v171_v6 }
 0x201   :  { %v108_v8 = vpop.xlane.xlu0 %107 }
 0x202   :  { %v109_v9 = vrot.slane %v108_v8, 4 }
 0x204   :  { %v110_v7 = vadd.f32 %v109_v9, %v108_v8 }
 0x206   :  { %v111_v10 = vrot.slane %v110_v7, 2 }
 0x208   :  { %v112_v11 = vadd.f32 %v111_v10, %v110_v7 }
 0x20a   :  { %v173_v12 = vpop.xlane.xlu0 %172  ;;  %v113_v14 = vrot.slane %v112_v11, 1 }
 0x20b   :  { %v174_v15 = vrot.slane %v173_v12, 4 }
 0x20c   :  { %v114_v16 = vadd.f32 %v113_v14, %v112_v11 }
 0x20d   :  { %v175_v13 = vadd.f32 %v174_v15, %v173_v12 }
 0x20e   :  { %210 = vpush %v114_v16 }
 0x20f   :  { %v176_v17 = vrot.slane %v175_v13, 2 }
 0x211   :  { %v177_v18 = vadd.f32 %v176_v17, %v175_v13 }
 0x213   :  { %v178_v19 = vrot.slane %v177_v18, 1 }
 0x215   :  { %v179_v20 = vadd.f32 %v178_v19, %v177_v18 }
 0x217   :  { %212 = vpush %v179_v20 }
 0x23f   :  { %s211_s0 = spop %210 }
 0x240   :  { %117 = sst [smem:[#allocation8]] %s211_s0 }
 0x241   :  { %307 = shalt.err (!%p304_p12)
}
 0x242   :  { %s332_s21 = smov [#allocation8]   ;;  %s308_s28 = scalar_lea.hbm %s483_s6, 16 }
 0x243   :  { %190 = dma.smem_to_hbm %s332_s21, 16, %s482_s5, [#allocation4]  }
 0x244   :  { %p309_p13 = scmp.ne.s32.totalorder %s483_s6, %s308_s28  ;;  %p312_p0 = scmp.lt.u32.totalorder %s308_s28, %s483_s6 }
 0x246   :  { %p314_p1 = pnand %p312_p0, %p309_p13 }
 0x248   :  { %s213_s25 = spop %212 }
 0x249   :  { %182 = sst [smem:[#allocation9]] %s213_s25 }
 0x24a   :  { %317 = shalt.err (!%p314_p1)
}
 0x24b   :  { %s333_s1 = smov [#allocation9]  }
 0x24c   :  { %198 = dma.smem_to_hbm %s333_s1, 16, %s483_s6, [#allocation10]  }
 0x24d   :  { %322 = dma.done.wait [#allocation4], 16  }
 0x24e   :  { %323 = vsyncadd [#allocation4], 4294967280 }
 0x24f   :  { %324 = dma.done.wait [#allocation10], 16  }
 0x250   :  { %325 = vsyncadd [#allocation10], 4294967280 }
 0x251   :  { %205 = sfence }
 0x252   :  { %206 = vsyncpa [#allocation3], 1 }
 0x253   :  { %207 = vsyncpa [#allocation6], 1 }
 0x254   :  { %208 = vsyncpa [#allocation4], 1 }
 0x255   :  { %209 = vsyncpa [#allocation10], 1 }

</bundles_post_ra>
